<compile_context>
chip_gen: v5e
topology: v5e:2x2
jax: 0.10.0
libtpu: 0.0.40
codegen_flags: <defaults>
</compile_context>

<pallas_src>
import functools

import jax
import jax.numpy as jnp
from jax.experimental import pallas as pl
from jax.experimental.pallas import tpu as pltpu


def _drs_kernel(rf_ref, gf_ref, w_ref, out_ref, *, inv_r):
    # fc (bias=False): region_weight = global_feature @ W   -> (tB, R)   [MXU]
    rw = jnp.dot(gf_ref[...], w_ref[...], preferred_element_type=jnp.float32)

    # einsum('bir,bi->bir') followed by mean(dim=1), fused:
    #   out[b, d] = (1/R) * sum_i rf[b, i, d] * rw[b, i]
    weighted = rf_ref[...] * rw[:, :, None]          # VPU broadcast-multiply
    out_ref[...] = jnp.sum(weighted, axis=1) * inv_r  # sublane reduce (XLU) + scale


def _pick_batch_tile(batch):
    # Largest tile that amortizes the ~0.35 us per-step overhead while keeping
    # double-buffered (tB, R, D) tiles well under the scoped VMEM limit.
    if batch <= 512:
        return batch
    for t in (512, 256, 128, 64, 32, 16, 8):
        if batch % t == 0:
            return t
    return batch  # ragged batch: fall back to a single block (rare)


def dynamic_region_selection(region_feature, global_feature, w):
    B, R, D = region_feature.shape
    Bg, E = global_feature.shape
    assert Bg == B and w.shape == (E, R)

    tb = _pick_batch_tile(B)
    grid = (B // tb,)

    kernel = functools.partial(_drs_kernel, inv_r=1.0 / R)

    # Scheduler hint: fc matmul + weighted reduce; traffic dominated by region_feature.
    cost = pl.CostEstimate(
        flops=2 * B * E * R + 2 * B * R * D,
        transcendentals=0,
        bytes_accessed=4 * (B * R * D + B * E + E * R + B * D),
    )

    return pl.pallas_call(
        kernel,
        out_shape=jax.ShapeDtypeStruct((B, D), jnp.float32),
        grid_spec=pltpu.PrefetchScalarGridSpec(
            num_scalar_prefetch=0,
            grid=grid,
            in_specs=[
                pl.BlockSpec((tb, R, D), lambda b: (b, 0, 0)),  # region_feature tile
                pl.BlockSpec((tb, E), lambda b: (b, 0)),        # global_feature tile
                pl.BlockSpec((E, R), lambda b: (0, 0)),         # fc weight, resident
            ],
            out_specs=pl.BlockSpec((tb, D), lambda b: (b, 0)),
        ),
        compiler_params=pltpu.CompilerParams(
            dimension_semantics=("parallel",),
        ),
        cost_estimate=cost,
    )(region_feature, global_feature, w)


def reference(region_feature, global_feature, w):
    rw = global_feature @ w                        # (B, R)
    refined = region_feature * rw[:, :, None]      # 'bir,bi->bir'
    return refined.mean(axis=1)                    # (B, D)


if __name__ == "__main__":
    # Small shapes consistent with the module's forward pass.
    B, R = 2, 8          # batch, region_num
    E = 32               # v_embedding_dim (global feature dim)
    D = 32               # per-region feature dim

    key = jax.random.PRNGKey(0)
    k0, k1, k2 = jax.random.split(key, 3)

    region_feature = jax.random.normal(k0, (B, R, D), dtype=jnp.float32)
    global_feature = jax.random.normal(k1, (B, E), dtype=jnp.float32)

    # nn.Linear(E, R, bias=False) default init: U(-1/sqrt(E), 1/sqrt(E)).
    lim = 1.0 / jnp.sqrt(jnp.float32(E))
    w = jax.random.uniform(k2, (E, R), jnp.float32, -lim, lim)  # stored pre-transposed

    out = dynamic_region_selection(region_feature, global_feature, w)
    out = jax.block_until_ready(out)

    ref = reference(region_feature, global_feature, w)
    assert out.shape == (B, D)
    assert jnp.allclose(out, ref, atol=1e-5, rtol=1e-5)

    print("KERNEL_OK")
</pallas_src>

<mosaic_0001>
module attributes {stable_mosaic.version = 11 : i64} {
  func.func @_drs_kernel(%arg0: i32, %arg1: memref<2x8x32xf32, #tpu.memory_space<vmem>>, %arg2: memref<2x32xf32, #tpu.memory_space<vmem>>, %arg3: memref<32x8xf32, #tpu.memory_space<vmem>>, %arg4: memref<2x32xf32, #tpu.memory_space<vmem>>) attributes {dimension_semantics = [#tpu.dimension_semantics<parallel>], iteration_bounds = array<i64: 1>, scalar_prefetch = 0 : i64, scratch_operands = 0 : i64, tpu.core_type = #tpu.core_type<tc>, window_params = [{transform_indices = @transform_0, window_bounds = array<i64: 2, 8, 32>}, {transform_indices = @transform_1, window_bounds = array<i64: 2, 32>}, {pipeline_mode = #tpu.pipeline_mode<synchronous>, transform_indices = @transform_2, window_bounds = array<i64: 32, 8>}, {transform_indices = @transform_3, window_bounds = array<i64: 2, 32>}]} {
    %c0 = arith.constant 0 : index
    %c0_0 = arith.constant 0 : index
    %0 = vector.load %arg2[%c0, %c0_0] : memref<2x32xf32, #tpu.memory_space<vmem>>, vector<2x32xf32>
    %c0_1 = arith.constant 0 : index
    %c0_2 = arith.constant 0 : index
    %1 = vector.load %arg3[%c0_1, %c0_2] : memref<32x8xf32, #tpu.memory_space<vmem>>, vector<32x8xf32>
    %cst = arith.constant dense<0.000000e+00> : vector<2x8xf32>
    %2 = tpu.matmul %0, %1, %cst {dimension_numbers = #tpu.dot_dimension_numbers<[1], [0], [0], [1], [0, 0, 1, 1], [], []>} : vector<2x32xf32>, vector<32x8xf32>, vector<2x8xf32> -> vector<2x8xf32>
    %c0_3 = arith.constant 0 : index
    %c0_4 = arith.constant 0 : index
    %c0_5 = arith.constant 0 : index
    %3 = vector.load %arg1[%c0_3, %c0_4, %c0_5] : memref<2x8x32xf32, #tpu.memory_space<vmem>>, vector<2x8x32xf32>
    %4 = vector.shape_cast %2 : vector<2x8xf32> to vector<2x8x1xf32>
    %5 = vector.broadcast %4 : vector<2x8x1xf32> to vector<2x8x32xf32>
    %6 = arith.mulf %3, %5 : vector<2x8x32xf32>
    %cst_6 = arith.constant dense<0.000000e+00> : vector<2x32xf32>
    %7 = vector.multi_reduction <add>, %6, %cst_6 [1] : vector<2x8x32xf32> to vector<2x32xf32>
    %cst_7 = arith.constant 1.250000e-01 : f32
    %8 = vector.broadcast %cst_7 : f32 to vector<2x32xf32>
    %9 = arith.mulf %7, %8 : vector<2x32xf32>
    %c0_8 = arith.constant 0 : index
    %c0_9 = arith.constant 0 : index
    %10 = vector.load %arg4[%c0_8, %c0_9] : memref<2x32xf32, #tpu.memory_space<vmem>>, vector<2x32xf32>
    tpu.vector_store %arg4[%c0_8, %c0_9], %9 {strides = array<i32>} : memref<2x32xf32, #tpu.memory_space<vmem>>, vector<2x32xf32>,
    return
  }
  func.func @transform_0(%arg0: i32) -> (i32, i32, i32) {
    %c0_i32 = arith.constant 0 : i32
    %c0_i32_0 = arith.constant 0 : i32
    %c0_i32_1 = arith.constant 0 : i32
    return %arg0, %c0_i32, %c0_i32_0 : i32, i32, i32
  }
  func.func @transform_1(%arg0: i32) -> (i32, i32) {
    %c0_i32 = arith.constant 0 : i32
    %c0_i32_0 = arith.constant 0 : i32
    return %arg0, %c0_i32 : i32, i32
  }
  func.func @transform_2(%arg0: i32) -> (i32, i32) {
    %c0_i32 = arith.constant 0 : i32
    %c0_i32_0 = arith.constant 0 : i32
    %c0_i32_1 = arith.constant 0 : i32
    return %c0_i32, %c0_i32_0 : i32, i32
  }
  func.func @transform_3(%arg0: i32) -> (i32, i32) {
    %c0_i32 = arith.constant 0 : i32
    %c0_i32_0 = arith.constant 0 : i32
    return %arg0, %c0_i32 : i32, i32
  }
}

</mosaic_0001>

<bundles_post_ra>
// kernel: tpu_custom_call.1
= control target key start
LH: loop header
LB: loop body
LE: loop exit
PB: predicated region body
PF: predicated region fallthrough
CT: control target
= control target key end

     0   :  { %v47_v2 = vlaneseq  ;;  %s178_s0 = inlined_call_operand.vmem [shape: f32[2,8,32], index: 0, kind: input, shape index: {}]   ;;  %s179_s1 = inlined_call_operand.vmem [shape: f32[2,32], index: 1, kind: input, shape index: {}]   ;;  %s180_s2 = inlined_call_operand.vmem [shape: f32[32,8], index: 2, kind: input, shape index: {}]   ;;  %s181_s3 = inlined_call_operand.hbm [shape: f32[2,32], index: 3, kind: output, shape index: {}]  }
   0x1   :  { %v19_v0 = vld [vmem:[%s180_s2 + $0x18] sm:$0xff]  ;;  %v18_v1 = vld [vmem:[%s180_s2 + $0x10] sm:$0xff] }
   0x2   :  { %36 = vmatpush.msra.mxu0 %v19_v0 }
   0x3   :  { %8 = vsyncpa [#allocation3], 0  ;;  %v17_v3 = vld [vmem:[%s180_s2 + $0x8] sm:$0xff]  ;;  %v48_v4 = vshrl.u32 %v47_v2, 7  ;;  %v16_v5 = vld [vmem:[%s180_s2] sm:$0xff]  ;;  %vm20_vm0 = vcmask 261120  }
   0x4   :  { %37 = vmatpush.msra.mxu0 %v18_v1  ;;  %v15_v6 = vld [vmem:[%s179_s1] sm:$0x3]  ;;  %v45_v16 = vld [vmem:[%s178_s0 + $0x8] sm:$0xff]  ;;  %s130_s24 = smov [#allocation2]   ;;  %vm80_vm1 = vcmask 1041409   ;;  %vm83_vm2 = vcmask 254976  }
   0x5   :  { %103 = vset.pattern.permute.xlu0 %v48_v4  ;;  %v44_v10 = vld [vmem:[%s178_s0] sm:$0xff]  ;;  %s90_s25 = sshll.u32 %s130_s24, 4  ;;  %s92_s0 = sshll.u32 %s181_s3, 4  ;;  %s91_s25 = int_to_ptr.vmem [resolvable:$true] %s90_s25  ;;  %s93_s0 = int_to_ptr.hbm [resolvable:$true] %s92_s0 }
   0x6   :  { %38 = vmatpush.msra.mxu0 %v17_v3 }
   0x8   :  { %39 = vmatpush.msra.mxu0 %v16_v5 }
   0x9   :  { %101 = vmatmul.msk.f32.vlgmr.msra.gmra.mxu0 %vm20_vm0, %v15_v6 }
  0x86   :  { %v41_v7 = vpop.f32.mrf.mxu0 }
  0x87   :  { %v46_v8 = vperm.slane %v41_v7, 0  ;;  %v53_v9 = vperm.slane %v41_v7, 1 }
  0x89   :  { %51 = vperm.xlu0 %103, %v46_v8  }
  0x91   :  { %58 = vperm.xlu0 %103, %v53_v9  }
  0xfb   :  { %v52_v11 = vpop.permute.xlu0 %51 }
  0xfc   :  { %v60_v12 = vmul.f32 %v52_v11, %v44_v10 }
  0xfe   :  { %v62_v13 = vsel %vm20_vm0, %v60_v12, 0.0 }
  0xff   :  { %v63_v14 = vrot.slane %v62_v13, 4 }
 0x101   :  { %v64_v15 = vadd.f32 %v63_v14, %v62_v13 }
 0x103   :  { %v65_v17 = vrot.slane %v64_v15, 2  ;;  %v59_v18 = vpop.permute.xlu0 %58 }
 0x104   :  { %v61_v19 = vmul.f32 %v59_v18, %v45_v16 }
 0x105   :  { %v66_v21 = vadd.f32 %v65_v17, %v64_v15 }
 0x106   :  { %v69_v20 = vsel %vm20_vm0, %v61_v19, 0.0 }
 0x107   :  { %v70_v22 = vrot.slane %v69_v20, 4  ;;  %v67_v24 = vrot.slane %v66_v21, 1 }
 0x109   :  { %v71_v23 = vadd.f32 %v70_v22, %v69_v20  ;;  %v68_v27 = vadd.f32 %v67_v24, %v66_v21 }
 0x10b   :  { %v72_v25 = vrot.slane %v71_v23, 2  ;;  %v76_v30 = vmul.f32 0.125, %v68_v27 }
 0x10d   :  { %v73_v26 = vadd.f32 %v72_v25, %v71_v23 }
 0x10f   :  { %v74_v28 = vrot.slane %v73_v26, 1 }
 0x111   :  { %v75_v29 = vadd.f32 %v74_v28, %v73_v26 }
 0x113   :  { %v77_v31 = vmul.f32 0.125, %v75_v29 }
 0x115   :  { %v81_v32 = vsel %vm80_vm1, %v77_v31, %v76_v30 }
 0x116   :  { %84 = vst.msk [vmem:[#allocation2] sm:$0x3] %vm83_vm2, %v81_v32 }
 0x117   :  { %95 = dma.vmem_to_hbm [thread:$0]  %s91_s25, 32, %s93_s0, [#allocation3]  }
 0x118   :  { %128 = dma.done.wait [#allocation3], 32  }
 0x119   :  { %129 = vsyncadd [#allocation3], 4294967264 }
 0x11a   :  { %100 = vsyncpa [#allocation3], 1 }

</bundles_post_ra>
